<compile_context>
chip_gen: v5e
topology: v5e:2x2
jax: 0.10.0
libtpu: 0.0.40
codegen_flags: <defaults>
</compile_context>

<pallas_src>
import jax
import jax.numpy as jnp
from jax.experimental import pallas as pl
from jax.experimental.pallas import tpu as pltpu

STATE_DIM = 3      # Pendulum-v0 observation dim
ACTION_DIM = 1     # Pendulum-v0 action dim
H1, H2 = 100, 20
MAX_ACTION = 2.0

# ---- packed parameter slab: one (288, 128) f32 block, every slice lane/sublane aligned
# row offsets are multiples of 8 (sublane tile); every slice starts at column 0 (lane 0).
R_W1 = 0      # rows   0:100, cols 0:3   -> W1 (100, 3)   [torch layout: out x in]
R_W2 = 104    # rows 104:124, cols 0:100 -> W2 (20, 100)
R_B1 = 128    # rows 128:228, col  0     -> b1 (100,) as a column
R_B2 = 232    # rows 232:252, col  0     -> b2 (20,)  as a column
R_W3 = 256    # rows 256:276, col  0     -> W3^T (20,) as a column
R_B3 = 280    # row  280,     col  0     -> b3 scalar
PACK_ROWS = 288                      # multiple of 8
PACK_COLS = 128                      # one full lane tile


def _round_up(n, m):
    return ((n + m - 1) // m) * m


def _cdiv(a, b):
    return -(-a // b)


def _choose_tiling(B, tb_cap=2048):
    """Pick (TB, n_blocks): big tiles (amortize ~0.35us/step), 128-multiple lanes,
    and an even block count (>=2) when there is enough work so v7x's two TensorCores
    split the 'parallel' batch axis evenly."""
    b128 = _round_up(max(B, 1), 128)
    if b128 <= 128:
        return 128, 1
    n = max(2, _cdiv(b128, tb_cap))
    n += n % 2                               # even split for the two v7x TensorCores
    tb = _round_up(_cdiv(b128, n), 128)
    n = _cdiv(b128, tb)                      # drop now-empty trailing blocks
    return tb, n


def actor_kernel(x_ref, p_ref, o_ref):
    # x_ref: (TB, STATE_DIM) input tile in its natural (batch, state) layout
    # p_ref: (PACK_ROWS, PACK_COLS) packed parameters (VMEM-resident across the grid)
    # o_ref: (1, TB) lane-dense output tile (batch on lanes)
    x = x_ref[...]                                       # (TB, 3)

    w1 = p_ref[R_W1:R_W1 + H1, 0:STATE_DIM]              # (100, 3)   lane-aligned
    w2 = p_ref[R_W2:R_W2 + H2, 0:H1]                     # (20, 100)  lane-aligned
    b1 = p_ref[R_B1:R_B1 + H1, 0:1]                      # (100, 1)   lane 0
    b2 = p_ref[R_B2:R_B2 + H2, 0:1]                      # (20, 1)    lane 0
    w3 = p_ref[R_W3:R_W3 + H2, 0:1]                      # (20, 1)    lane 0
    b3 = p_ref[R_B3:R_B3 + 1, 0:1]                       # (1, 1)     lane 0

    # fc1 + ReLU (MXU): contract the shared state dim of w1 (out,in) and x (batch,in);
    # result is (100, TB) with batch on lanes.  Keeping weights as the MXU LHS keeps
    # the push count low — do not restructure to batch-as-M.
    h1 = jax.lax.dot_general(w1, x, (((1,), (1,)), ((), ())),
                             preferred_element_type=jnp.float32) + b1
    h1 = jnp.maximum(h1, 0.0)
    # fc2 + ReLU (MXU)
    h2 = jnp.dot(w2, h1, preferred_element_type=jnp.float32) + b2     # (20, TB)
    h2 = jnp.maximum(h2, 0.0)
    # fc3 (20 -> 1) on the VPU/XLU: broadcast multiply + cross-sublane reduce (no MXU pad)
    o = jnp.sum(h2 * w3, axis=0, keepdims=True) + b3                  # (1, TB)
    # tanh on the EUP, scale on the VPU
    o_ref[...] = MAX_ACTION * jnp.tanh(o)


def actor_forward(x, packed_params, *, block_b_cap=2048):
    """x: (B, STATE_DIM) f32 -> (B, ACTION_DIM) f32.

    No wrapper-side transpose or zero-pad: x is consumed in its natural layout and
    ragged final blocks are masked by Pallas; padded lanes of the output never reach HBM
    beyond column B.  The (1, B) -> (B, 1) reshape at the end is a free bitcast.
    """
    B = x.shape[0]
    TB, n_blocks = _choose_tiling(B, block_b_cap)

    flops = 2 * B * (STATE_DIM * H1 + H1 * H2 + H2 * ACTION_DIM)
    bytes_accessed = 4 * (B * STATE_DIM + B * ACTION_DIM + PACK_ROWS * PACK_COLS)

    out = pl.pallas_call(
        actor_kernel,
        out_shape=jax.ShapeDtypeStruct((1, B), jnp.float32),
        grid=(n_blocks,),
        in_specs=[
            pl.BlockSpec((TB, STATE_DIM), lambda i: (i, 0)),
            # constant index_map -> fetched once, kept VMEM-resident for all steps.
            # (Left at default buffering: the duplicate 144 KiB buffer is noise.)
            pl.BlockSpec((PACK_ROWS, PACK_COLS), lambda i: (0, 0)),
        ],
        out_specs=pl.BlockSpec((1, TB), lambda i: (0, i)),
        compiler_params=pltpu.CompilerParams(
            dimension_semantics=("parallel",)),   # megacore batch split on v7x
        cost_estimate=pl.CostEstimate(
            flops=flops, transcendentals=B, bytes_accessed=bytes_accessed),
    )(x, packed_params)

    return out.reshape(B, ACTION_DIM)


def init_params(key):
    """Xavier-normal weights (matching Actor.init_weight()), zero biases.
    Weights use torch's [out_features, in_features] layout."""
    k1, k2, k3 = jax.random.split(key, 3)

    def xavier(k, fan_out, fan_in):
        std = (2.0 / (fan_in + fan_out)) ** 0.5
        return std * jax.random.normal(k, (fan_out, fan_in), jnp.float32)

    w1 = xavier(k1, H1, STATE_DIM)
    b1 = jnp.zeros((H1,), jnp.float32)
    w2 = xavier(k2, H2, H1)
    b2 = jnp.zeros((H2,), jnp.float32)
    w3 = xavier(k3, ACTION_DIM, H2)
    b3 = jnp.zeros((ACTION_DIM,), jnp.float32)
    return (w1, b1, w2, b2, w3, b3)


def pack_params(params):
    """Pack all Actor parameters into one (288, 128) f32 slab (single DMA, all slices
    lane-0 / sublane-aligned)."""
    w1, b1, w2, b2, w3, b3 = params
    slab = jnp.zeros((PACK_ROWS, PACK_COLS), jnp.float32)
    slab = slab.at[R_W1:R_W1 + H1, 0:STATE_DIM].set(w1)
    slab = slab.at[R_W2:R_W2 + H2, 0:H1].set(w2)
    slab = slab.at[R_B1:R_B1 + H1, 0].set(b1)
    slab = slab.at[R_B2:R_B2 + H2, 0].set(b2)
    slab = slab.at[R_W3:R_W3 + H2, 0].set(w3[0])
    slab = slab.at[R_B3, 0].set(b3[0])
    return slab


def actor_reference(x, params):
    w1, b1, w2, b2, w3, b3 = params
    h = jnp.maximum(x @ w1.T + b1, 0.0)
    h = jnp.maximum(h @ w2.T + b2, 0.0)
    return MAX_ACTION * jnp.tanh(h @ w3.T + b3)


if __name__ == "__main__":
    key = jax.random.PRNGKey(0)
    pkey, xkey, xkey2, xkey3 = jax.random.split(key, 4)
    params = init_params(pkey)
    packed = pack_params(params)

    # Small deterministic input consistent with Pendulum-v0 (state_dim=3).
    batch = 8
    x = jax.random.normal(xkey, (batch, STATE_DIM), jnp.float32)
    out = jax.block_until_ready(actor_forward(x, packed))
    ref = actor_reference(x, params)
    assert out.shape == (batch, ACTION_DIM)
    assert jnp.allclose(out, ref, atol=2e-5, rtol=2e-5), "mismatch vs reference (small batch)"

    # Multi-block path: B=1280 -> TB=640, grid=(2,) (even block count, no padding waste).
    big_batch = 1280
    xb = jax.random.normal(xkey2, (big_batch, STATE_DIM), jnp.float32)
    outb = jax.block_until_ready(actor_forward(xb, packed))
    refb = actor_reference(xb, params)
    assert outb.shape == (big_batch, ACTION_DIM)
    assert jnp.allclose(outb, refb, atol=2e-5, rtol=2e-5), "mismatch vs reference (large batch)"

    # Ragged path: B=300 -> TB=256, grid=(2,), masked partial final block.
    odd_batch = 300
    xo = jax.random.normal(xkey3, (odd_batch, STATE_DIM), jnp.float32)
    outo = jax.block_until_ready(actor_forward(xo, packed))
    refo = actor_reference(xo, params)
    assert outo.shape == (odd_batch, ACTION_DIM)
    assert jnp.allclose(outo, refo, atol=2e-5, rtol=2e-5), "mismatch vs reference (ragged batch)"

    print("KERNEL_OK")
</pallas_src>

<mosaic_0001>
module attributes {stable_mosaic.version = 11 : i64} {
  func.func @actor_kernel(%arg0: i32, %arg1: memref<128x3xf32, #tpu.memory_space<vmem>>, %arg2: memref<288x128xf32, #tpu.memory_space<vmem>>, %arg3: memref<1x128xf32, #tpu.memory_space<vmem>>) attributes {dimension_semantics = [#tpu.dimension_semantics<parallel>], iteration_bounds = array<i64: 1>, scalar_prefetch = 0 : i64, scratch_operands = 0 : i64, tpu.core_type = #tpu.core_type<tc>, window_params = [{transform_indices = @transform_0, window_bounds = array<i64: 128, 3>}, {pipeline_mode = #tpu.pipeline_mode<synchronous>, transform_indices = @transform_1, window_bounds = array<i64: 288, 128>}, {transform_indices = @transform_2, window_bounds = array<i64: 1, 128>}]} {
    %c0 = arith.constant 0 : index
    %c0_0 = arith.constant 0 : index
    %0 = vector.load %arg1[%c0, %c0_0] : memref<128x3xf32, #tpu.memory_space<vmem>>, vector<128x3xf32>
    %c0_1 = arith.constant 0 : index
    %c0_2 = arith.constant 0 : index
    %1 = vector.load %arg2[%c0_1, %c0_2] : memref<288x128xf32, #tpu.memory_space<vmem>>, vector<100x3xf32>
    %c104 = arith.constant 104 : index
    %c0_3 = arith.constant 0 : index
    %2 = vector.load %arg2[%c104, %c0_3] : memref<288x128xf32, #tpu.memory_space<vmem>>, vector<20x100xf32>
    %c128 = arith.constant 128 : index
    %c0_4 = arith.constant 0 : index
    %3 = vector.load %arg2[%c128, %c0_4] : memref<288x128xf32, #tpu.memory_space<vmem>>, vector<100x1xf32>
    %c232 = arith.constant 232 : index
    %c0_5 = arith.constant 0 : index
    %4 = vector.load %arg2[%c232, %c0_5] : memref<288x128xf32, #tpu.memory_space<vmem>>, vector<20x1xf32>
    %c256 = arith.constant 256 : index
    %c0_6 = arith.constant 0 : index
    %5 = vector.load %arg2[%c256, %c0_6] : memref<288x128xf32, #tpu.memory_space<vmem>>, vector<20x1xf32>
    %c280 = arith.constant 280 : index
    %c0_7 = arith.constant 0 : index
    %6 = vector.load %arg2[%c280, %c0_7] : memref<288x128xf32, #tpu.memory_space<vmem>>, vector<1x1xf32>
    %cst = arith.constant dense<0.000000e+00> : vector<100x128xf32>
    %7 = tpu.matmul %1, %0, %cst {dimension_numbers = #tpu.dot_dimension_numbers<[1], [1], [0], [0], [0, 0, 1, 0], [], []>} : vector<100x3xf32>, vector<128x3xf32>, vector<100x128xf32> -> vector<100x128xf32>
    %8 = vector.broadcast %3 : vector<100x1xf32> to vector<100x128xf32>
    %9 = arith.addf %7, %8 : vector<100x128xf32>
    %cst_8 = arith.constant 0.000000e+00 : f32
    %10 = vector.broadcast %cst_8 : f32 to vector<100x128xf32>
    %11 = arith.maximumf %9, %10 : vector<100x128xf32>
    %cst_9 = arith.constant dense<0.000000e+00> : vector<20x128xf32>
    %12 = tpu.matmul %2, %11, %cst_9 {dimension_numbers = #tpu.dot_dimension_numbers<[1], [0], [0], [1], [0, 0, 1, 1], [], []>} : vector<20x100xf32>, vector<100x128xf32>, vector<20x128xf32> -> vector<20x128xf32>
    %13 = vector.broadcast %4 : vector<20x1xf32> to vector<20x128xf32>
    %14 = arith.addf %12, %13 : vector<20x128xf32>
    %cst_10 = arith.constant 0.000000e+00 : f32
    %15 = vector.broadcast %cst_10 : f32 to vector<20x128xf32>
    %16 = arith.maximumf %14, %15 : vector<20x128xf32>
    %17 = vector.broadcast %5 : vector<20x1xf32> to vector<20x128xf32>
    %18 = arith.mulf %16, %17 : vector<20x128xf32>
    %cst_11 = arith.constant dense<0.000000e+00> : vector<128xf32>
    %19 = vector.multi_reduction <add>, %18, %cst_11 [0] : vector<20x128xf32> to vector<128xf32>
    %20 = vector.shape_cast %19 : vector<128xf32> to vector<1x128xf32>
    %21 = vector.broadcast %6 : vector<1x1xf32> to vector<1x128xf32>
    %22 = arith.addf %20, %21 : vector<1x128xf32>
    %23 = math.tanh %22 : vector<1x128xf32>
    %cst_12 = arith.constant 2.000000e+00 : f32
    %24 = vector.broadcast %cst_12 : f32 to vector<1x128xf32>
    %25 = arith.mulf %24, %23 : vector<1x128xf32>
    %c0_13 = arith.constant 0 : index
    %c0_14 = arith.constant 0 : index
    %26 = vector.load %arg3[%c0_13, %c0_14] : memref<1x128xf32, #tpu.memory_space<vmem>>, vector<1x128xf32>
    tpu.vector_store %arg3[%c0_13, %c0_14], %25 {strides = array<i32>} : memref<1x128xf32, #tpu.memory_space<vmem>>, vector<1x128xf32>,
    return
  }
  func.func @transform_0(%arg0: i32) -> (i32, i32) {
    %c0_i32 = arith.constant 0 : i32
    %c0_i32_0 = arith.constant 0 : i32
    return %arg0, %c0_i32 : i32, i32
  }
  func.func @transform_1(%arg0: i32) -> (i32, i32) {
    %c0_i32 = arith.constant 0 : i32
    %c0_i32_0 = arith.constant 0 : i32
    %c0_i32_1 = arith.constant 0 : i32
    return %c0_i32, %c0_i32_0 : i32, i32
  }
  func.func @transform_2(%arg0: i32) -> (i32, i32) {
    %c0_i32 = arith.constant 0 : i32
    %c0_i32_0 = arith.constant 0 : i32
    return %c0_i32, %arg0 : i32, i32
  }
}

</mosaic_0001>

<bundles_post_ra>
// kernel: tpu_custom_call.1
= control target key start
LH: loop header
LB: loop body
LE: loop exit
PB: predicated region body
PF: predicated region fallthrough
CT: control target
= control target key end

     0   :  { %7 = vsyncpa [#allocation3], 0  ;;  %s677_s0 = inlined_call_operand.vmem [shape: f32[8,3], index: 0, kind: input, shape index: {}]   ;;  %s678_s1 = inlined_call_operand.hbm [shape: f32[288,128], index: 1, kind: input, shape index: {}]   ;;  %s679_s2 = inlined_call_operand.hbm [shape: f32[1,8], index: 2, kind: output, shape index: {}]  }
   0x1   :  { %8 = vsyncpa [#allocation4], 0  ;;  %s15_s11 = sshll.u32 %s678_s1, 4  ;;  %s540_s12 = smov [#allocation2]   ;;  %s16_s11 = int_to_ptr.hbm [resolvable:$true] %s15_s11 }
   0x2   :  { %s17_s13 = sshll.u32 %s540_s12, 4  ;;  %s541_s14 = smov 128   ;;  %s18_s13 = int_to_ptr.vmem [resolvable:$true] %s17_s13 }
   0x3   :  { %s542_s15 = smov 8  }
   0x4   :  { %23 = dma.hbm_to_vmem [thread:$0]  %s16_s11, 4608, %s18_s13, [#allocation3], %s541_s14, %s541_s14, %s542_s15  }
   0x5   :  { %536 = dma.done.wait [#allocation3], 4608  }
   0x6   :  { %537 = vsyncadd [#allocation3], 4294962688  ;;  %vm145_vm0 = vcmask 23552   ;;  %v43_v0 = vld [vmem:[%s677_s0 + $0x78] sm:$0xff]  ;;  %v42_v1 = vld [vmem:[%s677_s0 + $0x70] sm:$0xff]  ;;  %v543_v6 = vmov 0  }
   0x7   :  { %413 = vmatpush.xpose.msk.msra.mxu0 %vm145_vm0, %v43_v0  ;;  %447 = vmatpush.xpose.msk.msra.mxu3 %vm145_vm0, %v43_v0  ;;  %v41_v2 = vld [vmem:[%s677_s0 + $0x68] sm:$0xff]  ;;  %v40_v3 = vld [vmem:[%s677_s0 + $0x60] sm:$0xff]  ;;  %v39_v5 = vld [vmem:[%s677_s0 + $0x58] sm:$0xff]  ;;  %vm327_vm1 = vcmask 1043456   ;;  %vm317_vm2 = vcmask 818176   ;;  %s403_s21 = sshll.u32 %s679_s2, 4  ;;  %s404_s21 = int_to_ptr.hbm [resolvable:$true] %s403_s21 }
   0x8   :  { %446 = vmatpush.xpose.msk.msra.mxu2 %vm145_vm0, %v43_v0  ;;  %v72_v4 = vld [vmem:[#allocation2 + $0xe0] sm:$0xf]  ;;  %483 = vset.pattern.permute.xlu0 %v543_v6  ;;  %v70_v7 = vld [vmem:[#allocation2 + $0xd0] sm:$0xff]  ;;  %v71_v9 = vld [vmem:[#allocation2 + $0xd8] sm:$0xff] }
   0x9   :  { %142 = vperm.xlu0 %483, %v72_v4   ;;  %484 = vset.pattern.permute.xlu1 %v543_v6  ;;  %v38_v8 = vld [vmem:[%s677_s0 + $0x50] sm:$0xff]  ;;  %v37_v10 = vld [vmem:[%s677_s0 + $0x48] sm:$0xff]  ;;  %v36_v12 = vld [vmem:[%s677_s0 + $0x40] sm:$0xff] }
   0xa   :  { %485 = vset.pattern.permute.xlu2 %v543_v6  ;;  %132 = vperm.xlu1 %484, %v70_v7   ;;  %v69_v11 = vld [vmem:[#allocation2 + $0xc8] sm:$0xff]  ;;  %v66_v13 = vld [vmem:[#allocation2 + $0xb0] sm:$0xff]  ;;  %v35_v14 = vld [vmem:[%s677_s0 + $0x38] sm:$0xff] }
   0xb   :  { %414 = vmatpush.xpose.msk.msra.mxu0 %vm145_vm0, %v42_v1  ;;  %449 = vmatpush.xpose.msk.msra.mxu3 %vm145_vm0, %v42_v1  ;;  %v65_v15 = vld [vmem:[#allocation2 + $0xa8] sm:$0xff]  ;;  %v34_v16 = vld [vmem:[%s677_s0 + $0x30] sm:$0xff]  ;;  %v63_v17 = vld [vmem:[#allocation2 + $0x98] sm:$0xff] }
   0xc   :  { %448 = vmatpush.xpose.msk.msra.mxu2 %vm145_vm0, %v42_v1  ;;  %v33_v18 = vld [vmem:[%s677_s0 + $0x28] sm:$0xff]  ;;  %v62_v19 = vld [vmem:[#allocation2 + $0x90] sm:$0xff]  ;;  %v32_v20 = vld [vmem:[%s677_s0 + $0x20] sm:$0xff] }
   0xd   :  { %v60_v21 = vld [vmem:[#allocation2 + $0x80] sm:$0xff]  ;;  %v31_v22 = vld [vmem:[%s677_s0 + $0x18] sm:$0xff]  ;;  %v73_v23 = vld [vmem:[#allocation2 + $0xe8] sm:$0xff] }
   0xe   :  { %v68_v24 = vld [vmem:[#allocation2 + $0xc0] sm:$0xff]  ;;  %v30_v25 = vld [vmem:[%s677_s0 + $0x10] sm:$0xff]  ;;  %v29_v26 = vld [vmem:[%s677_s0 + $0x8] sm:$0xff] }
   0xf   :  { %415 = vmatpush.xpose.msk.msra.mxu0 %vm145_vm0, %v41_v2  ;;  %451 = vmatpush.xpose.msk.msra.mxu3 %vm145_vm0, %v41_v2  ;;  %v75_v27 = vld [vmem:[#allocation2 + $0xf8] sm:$0xf]  ;;  %v76_v28 = vld [vmem:[#allocation2 + $0x100] sm:$0xff]  ;;  %v53_v32 = vld [vmem:[#allocation2 + $0x48] sm:$0xff] }
  0x10   :  { %450 = vmatpush.xpose.msk.msra.mxu2 %vm145_vm0, %v41_v2  ;;  %122 = vperm.xlu2 %485, %v68_v24   ;;  %v67_v29 = vld [vmem:[#allocation2 + $0xb8] sm:$0xff]  ;;  %v28_v30 = vld [vmem:[%s677_s0] sm:$0xff]  ;;  %v50_v33 = vld [vmem:[#allocation2 + $0x30] sm:$0xff]  ;;  %s544_s0 = smov [#allocation5]  }
  0x11   :  { %137 = vperm.xlu0 %483, %v71_v9   ;;  %v44_v31 = vld [vmem:[#allocation2] sm:$0xff]  ;;  %v78_v34 = vld [vmem:[#allocation2 + $0x110] sm:$0xf]  ;;  %v79_v35 = vld [vmem:[#allocation2 + $0x118] sm:$0x1]  ;;  %s401_s1 = sshll.u32 %s544_s0, 4  ;;  %s402_s1 = int_to_ptr.vmem [resolvable:$true] %s401_s1 }
  0x12   :  { %127 = vperm.xlu1 %484, %v69_v11   ;;  %v64_v36 = vld [vmem:[#allocation2 + $0xa0] sm:$0xff]  ;;  %v45_v37 = vld [vmem:[#allocation2 + $0x8] sm:$0xff]  ;;  %v54_v38 = vld [vmem:[#allocation2 + $0x50] sm:$0xff] }
  0x13   :  { %416 = vmatpush.xpose.msk.msra.mxu0 %vm145_vm0, %v40_v3  ;;  %453 = vmatpush.xpose.msk.msra.mxu3 %vm145_vm0, %v40_v3  ;;  %v51_v39 = vld [vmem:[#allocation2 + $0x38] sm:$0xff]  ;;  %v61_v40 = vld [vmem:[#allocation2 + $0x88] sm:$0xff]  ;;  %v46_v41 = vld [vmem:[#allocation2 + $0x10] sm:$0xff] }
  0x14   :  { %452 = vmatpush.xpose.msk.msra.mxu2 %vm145_vm0, %v40_v3  ;;  %v55_v42 = vld [vmem:[#allocation2 + $0x58] sm:$0xff]  ;;  %v52_v43 = vld [vmem:[#allocation2 + $0x40] sm:$0xff]  ;;  %v74_v44 = vld [vmem:[#allocation2 + $0xf0] sm:$0xff] }
  0x15   :  { %v47_v45 = vld [vmem:[#allocation2 + $0x18] sm:$0xff]  ;;  %v56_v46 = vld [vmem:[#allocation2 + $0x60] sm:$0xf]  ;;  %v77_v47 = vld [vmem:[#allocation2 + $0x108] sm:$0xff] }
  0x16   :  { %v48_v48 = vld [vmem:[#allocation2 + $0x20] sm:$0xff]  ;;  %v49_v49 = vld [vmem:[#allocation2 + $0x28] sm:$0xff] }
  0x17   :  { %417 = vmatpush.xpose.msk.msra.mxu0 %vm145_vm0, %v39_v5  ;;  %455 = vmatpush.xpose.msk.msra.mxu3 %vm145_vm0, %v39_v5 }
  0x18   :  { %454 = vmatpush.xpose.msk.msra.mxu2 %vm145_vm0, %v39_v5  ;;  %117 = vperm.xlu2 %485, %v67_v29  }
  0x19   :  { %112 = vperm.xlu0 %483, %v66_v13  }
  0x1a   :  { %107 = vperm.xlu1 %484, %v65_v15  }
  0x1b   :  { %418 = vmatpush.xpose.msk.msra.mxu0 %vm145_vm0, %v38_v8  ;;  %457 = vmatpush.xpose.msk.msra.mxu3 %vm145_vm0, %v38_v8 }
  0x1c   :  { %456 = vmatpush.xpose.msk.msra.mxu2 %vm145_vm0, %v38_v8 }
  0x1f   :  { %419 = vmatpush.xpose.msk.msra.mxu0 %vm145_vm0, %v37_v10  ;;  %459 = vmatpush.xpose.msk.msra.mxu3 %vm145_vm0, %v37_v10 }
  0x20   :  { %458 = vmatpush.xpose.msk.msra.mxu2 %vm145_vm0, %v37_v10  ;;  %102 = vperm.xlu2 %485, %v64_v36  }
  0x21   :  { %97 = vperm.xlu0 %483, %v63_v17  }
  0x22   :  { %92 = vperm.xlu1 %484, %v62_v19  }
  0x23   :  { %420 = vmatpush.xpose.msk.msra.mxu0 %vm145_vm0, %v36_v12  ;;  %461 = vmatpush.xpose.msk.msra.mxu3 %vm145_vm0, %v36_v12 }
  0x24   :  { %460 = vmatpush.xpose.msk.msra.mxu2 %vm145_vm0, %v36_v12 }
  0x27   :  { %421 = vmatpush.xpose.msk.msra.mxu0 %vm145_vm0, %v35_v14  ;;  %463 = vmatpush.xpose.msk.msra.mxu3 %vm145_vm0, %v35_v14 }
  0x28   :  { %462 = vmatpush.xpose.msk.msra.mxu2 %vm145_vm0, %v35_v14  ;;  %87 = vperm.xlu2 %485, %v61_v40   ;;  %v59_v40 = vld [vmem:[#allocation2 + $0x78] sm:$0xf] }
  0x29   :  { %82 = vperm.xlu0 %483, %v60_v21  }
  0x2a   :  { %304 = vperm.xlu1 %484, %v73_v23  }
  0x2b   :  { %422 = vmatpush.xpose.msk.msra.mxu0 %vm145_vm0, %v34_v16  ;;  %465 = vmatpush.xpose.msk.msra.mxu3 %vm145_vm0, %v34_v16 }
  0x2c   :  { %464 = vmatpush.xpose.msk.msra.mxu2 %vm145_vm0, %v34_v16 }
  0x2f   :  { %423 = vmatpush.xpose.msk.msra.mxu0 %vm145_vm0, %v33_v18  ;;  %467 = vmatpush.xpose.msk.msra.mxu3 %vm145_vm0, %v33_v18 }
  0x30   :  { %466 = vmatpush.xpose.msk.msra.mxu2 %vm145_vm0, %v33_v18  ;;  %309 = vperm.xlu2 %485, %v74_v44  }
  0x31   :  { %314 = vperm.xlu0 %483, %v75_v27  }
  0x32   :  { %362 = vperm.xlu1 %484, %v76_v28  }
  0x33   :  { %424 = vmatpush.xpose.msk.msra.mxu0 %vm145_vm0, %v32_v20  ;;  %469 = vmatpush.xpose.msk.msra.mxu3 %vm145_vm0, %v32_v20 }
  0x34   :  { %468 = vmatpush.xpose.msk.msra.mxu2 %vm145_vm0, %v32_v20 }
  0x37   :  { %425 = vmatpush.xpose.msk.msra.mxu0 %vm145_vm0, %v31_v22  ;;  %471 = vmatpush.xpose.msk.msra.mxu3 %vm145_vm0, %v31_v22 }
  0x38   :  { %470 = vmatpush.xpose.msk.msra.mxu2 %vm145_vm0, %v31_v22  ;;  %367 = vperm.xlu2 %485, %v77_v47  }
  0x39   :  { %372 = vperm.xlu0 %483, %v78_v34  }
  0x3a   :  { %389 = vperm.xlu1 %484, %v79_v35  }
  0x3b   :  { %426 = vmatpush.xpose.msk.msra.mxu0 %vm145_vm0, %v30_v25  ;;  %473 = vmatpush.xpose.msk.msra.mxu3 %vm145_vm0, %v30_v25 }
  0x3c   :  { %472 = vmatpush.xpose.msk.msra.mxu2 %vm145_vm0, %v30_v25 }
  0x3f   :  { %427 = vmatpush.xpose.msk.msra.mxu0 %vm145_vm0, %v29_v26  ;;  %475 = vmatpush.xpose.msk.msra.mxu3 %vm145_vm0, %v29_v26 }
  0x40   :  { %474 = vmatpush.xpose.msk.msra.mxu2 %vm145_vm0, %v29_v26 }
  0x43   :  { %428 = vmatpush.xpose.msk.msra.mxu0 %vm145_vm0, %v28_v30  ;;  %477 = vmatpush.xpose.msk.msra.mxu3 %vm145_vm0, %v28_v30 }
  0x44   :  { %476 = vmatpush.xpose.msk.msra.mxu2 %vm145_vm0, %v28_v30 }
  0x46   :  { %429 = vmatmul.msk.f32.vlgmr.msra.gmra.mxu0 %vm145_vm0, %v44_v31  ;;  %438 = vmatmul.msk.f32.vlgmr.msra.gmra.mxu3 %vm145_vm0, %v53_v32 }
  0x47   :  { %435 = vmatmul.msk.f32.vlgmr.msra.gmra.mxu2 %vm145_vm0, %v50_v33 }
  0x4e   :  { %430 = vmatmul.msk.f32.gmra.mxu0 %vm145_vm0, %v45_v37  ;;  %439 = vmatmul.msk.f32.gmra.mxu3 %vm145_vm0, %v54_v38  ;;  %v57_v38 = vld [vmem:[#allocation2 + $0x68] sm:$0xff] }
  0x4f   :  { %436 = vmatmul.msk.f32.gmra.mxu2 %vm145_vm0, %v51_v39  ;;  %v58_v39 = vld [vmem:[#allocation2 + $0x70] sm:$0xff] }
  0x56   :  { %431 = vmatmul.msk.f32.gmra.mxu0 %vm145_vm0, %v46_v41  ;;  %440 = vmatmul.msk.f32.gmra.mxu3 %vm145_vm0, %v55_v42 }
  0x57   :  { %437 = vmatmul.msk.f32.gmra.mxu2 %vm145_vm0, %v52_v43 }
  0x5e   :  { %432 = vmatmul.msk.f32.gmra.mxu0 %vm145_vm0, %v47_v45  ;;  %441 = vmatmul.msk.f32.gmra.mxu3 %vm145_vm0, %v56_v46 }
  0x66   :  { %433 = vmatmul.msk.f32.gmra.mxu0 %vm145_vm0, %v48_v48 }
  0x6a   :  { %v123_v58 = vpop.permute.xlu2 %122 }
  0x6e   :  { %434 = vmatmul.msk.f32.gmra.mxu0 %vm145_vm0, %v49_v49 }
  0x72   :  { %v118_v0 = vpop.permute.xlu2 %117 }
  0x7a   :  { %v103_v14 = vpop.permute.xlu2 %102 }
  0x7b   :  { %v143_v53 = vpop.permute.xlu0 %142 }
  0x7c   :  { %v133_v57 = vpop.permute.xlu1 %132 }
  0x82   :  { %v88_v28 = vpop.permute.xlu2 %87 }
  0x83   :  { %v138_v59 = vpop.permute.xlu0 %137 }
  0x84   :  { %v128_v63 = vpop.permute.xlu1 %127 }
  0x8a   :  { %v310_v42 = vpop.permute.xlu2 %309 }
  0x8b   :  { %v113_v1 = vpop.permute.xlu0 %112 }
  0x8c   :  { %v108_v13 = vpop.permute.xlu1 %107 }
  0x93   :  { %v98_v17 = vpop.permute.xlu0 %97 }
  0x94   :  { %v93_v27 = vpop.permute.xlu1 %92 }
  0x9b   :  { %v83_v31 = vpop.permute.xlu0 %82 }
  0x9c   :  { %v305_v44 = vpop.permute.xlu1 %304 }
  0xa3   :  { %v315_v45 = vpop.permute.xlu0 %314 }
  0xc3   :  { %v250_v50 = vpop.f32.mrf.mxu0 }
  0xc4   :  { %v251_v34 = vadd.f32 %v250_v50, %v83_v31 }
  0xc6   :  { %v289_v37 = vmax.f32 %v251_v34, 0.0 }
  0xc9   :  { %v277_v51 = vpop.f32.mrf.mxu3 }
  0xca   :  { %v268_v54 = vpop.f32.mrf.mxu2  ;;  %v278_v9 = vadd.f32 %v277_v51, %v128_v63  ;;  %v368_v51 = vpop.permute.xlu2 %367 }
  0xcb   :  { %v253_v52 = vpop.f32.mrf.mxu0  ;;  %v269_v19 = vadd.f32 %v268_v54, %v113_v1  ;;  %v363_v54 = vpop.permute.xlu1 %362 }
  0xcc   :  { %v298_v15 = vmax.f32 %v278_v9, 0.0  ;;  %v254_v32 = vadd.f32 %v253_v52, %v88_v28 }
  0xcd   :  { %v295_v23 = vmax.f32 %v269_v19, 0.0 }
  0xce   :  { %v290_v36 = vmax.f32 %v254_v32, 0.0 }
  0xd1   :  { %v280_v55 = vpop.f32.mrf.mxu3 }
  0xd2   :  { %v271_v61 = vpop.f32.mrf.mxu2  ;;  %v281_v6 = vadd.f32 %v280_v55, %v133_v57 }
  0xd3   :  { %v256_v56 = vpop.f32.mrf.mxu0  ;;  %v272_v16 = vadd.f32 %v271_v61, %v118_v0 }
  0xd4   :  { %v299_v11 = vmax.f32 %v281_v6, 0.0  ;;  %v257_v29 = vadd.f32 %v256_v56, %v93_v27  ;;  %v373_v56 = vpop.permute.xlu0 %372 }
  0xd5   :  { %v296_v21 = vmax.f32 %v272_v16, 0.0 }
  0xd6   :  { %v291_v35 = vmax.f32 %v257_v29, 0.0 }
  0xd9   :  { %v283_v60 = vpop.f32.mrf.mxu3 }
  0xda   :  { %v284_v3 = vadd.f32 %v283_v60, %v138_v59  ;;  %v274_v8 = vpop.f32.mrf.mxu2 }
  0xdb   :  { %v259_v62 = vpop.f32.mrf.mxu0  ;;  %v275_v12 = vadd.f32 %v274_v8, %v123_v58 }
  0xdc   :  { %v300_v10 = vmax.f32 %v284_v3, 0.0  ;;  %v260_v25 = vadd.f32 %v259_v62, %v98_v17 }
  0xdd   :  { %v297_v20 = vmax.f32 %v275_v12, 0.0 }
  0xde   :  { %v292_v33 = vmax.f32 %v260_v25, 0.0 }
  0xe1   :  { %v286_v2 = vpop.f32.mrf.mxu3 }
  0xe2   :  { %v287_v4 = vadd.f32 %v286_v2, %v143_v53 }
  0xe3   :  { %v262_v5 = vpop.f32.mrf.mxu0 }
  0xe4   :  { %v301_v7 = vmax.f32 %v287_v4, 0.0  ;;  %v263_v24 = vadd.f32 %v262_v5, %v103_v14  ;;  %v390_v4 = vpop.permute.xlu1 %389 }
  0xe6   :  { %442 = vmatpush.msk.msra.mxu1 %vm327_vm1, %v301_v7  ;;  %v293_v30 = vmax.f32 %v263_v24, 0.0 }
  0xe8   :  { %335 = vmatpush.msra.mxu1 %v300_v10 }
  0xea   :  { %336 = vmatpush.msra.mxu1 %v299_v11 }
  0xeb   :  { %v265_v18 = vpop.f32.mrf.mxu0 }
  0xec   :  { %337 = vmatpush.msra.mxu1 %v298_v15  ;;  %v266_v22 = vadd.f32 %v265_v18, %v108_v13 }
  0xee   :  { %338 = vmatpush.msra.mxu1 %v297_v20  ;;  %v294_v26 = vmax.f32 %v266_v22, 0.0 }
  0xf0   :  { %339 = vmatpush.msra.mxu1 %v296_v21 }
  0xf2   :  { %340 = vmatpush.msra.mxu1 %v295_v23 }
  0xf4   :  { %341 = vmatpush.msra.mxu1 %v294_v26 }
  0xf6   :  { %342 = vmatpush.msra.mxu1 %v293_v30 }
  0xf8   :  { %343 = vmatpush.msra.mxu1 %v292_v33 }
  0xfa   :  { %344 = vmatpush.msra.mxu1 %v291_v35 }
  0xfc   :  { %345 = vmatpush.msra.mxu1 %v290_v36 }
  0xfe   :  { %346 = vmatpush.msra.mxu1 %v289_v37 }
  0xff   :  { %443 = vmatmul.msk.f32.vlgmr.msra.gmra.mxu1 %vm317_vm2, %v57_v38 }
 0x107   :  { %444 = vmatmul.msk.f32.gmra.mxu1 %vm317_vm2, %v58_v39 }
 0x10f   :  { %445 = vmatmul.msk.f32.gmra.mxu1 %vm317_vm2, %v59_v40 }
 0x17c   :  { %v348_v41 = vpop.f32.mrf.mxu1 }
 0x17d   :  { %v349_v47 = vadd.f32 %v348_v41, %v305_v44 }
 0x17f   :  { %v357_v49 = vmax.f32 %v349_v47, 0.0 }
 0x181   :  { %v375_v57 = vmul.f32 %v363_v54, %v357_v49 }
 0x184   :  { %v351_v43 = vpop.f32.mrf.mxu1 }
 0x185   :  { %v352_v46 = vadd.f32 %v351_v43, %v310_v42 }
 0x187   :  { %v358_v48 = vmax.f32 %v352_v46, 0.0 }
 0x189   :  { %v376_v53 = vmul.f32 %v368_v51, %v358_v48 }
 0x18b   :  { %v378_v59 = vadd.f32 %v376_v53, %v375_v57 }
 0x18c   :  { %v354_v50 = vpop.f32.mrf.mxu1 }
 0x18d   :  { %v355_v52 = vadd.f32 %v354_v50, %v315_v45 }
 0x18f   :  { %v359_v55 = vmax.f32 %v355_v52, 0.0 }
 0x191   :  { %v377_v58 = vmul.f32 %v373_v56, %v359_v55 }
 0x193   :  { %v379_v60 = vsel %vm327_vm1, %v377_v58, 0.0 }
 0x194   :  { %v380_v61 = vadd.f32 %v379_v60, %v378_v59 }
 0x196   :  { %v381_v62 = vrot.slane %v380_v61, 4 }
 0x198   :  { %v382_v63 = vadd.f32 %v381_v62, %v380_v61 }
 0x19a   :  { %v383_v0 = vrot.slane %v382_v63, 2 }
 0x19c   :  { %v384_v1 = vadd.f32 %v383_v0, %v382_v63 }
 0x19e   :  { %v385_v2 = vrot.slane %v384_v1, 1 }
 0x1a0   :  { %v386_v3 = vadd.f32 %v385_v2, %v384_v1 }
 0x1a2   :  { %v392_v5 = vadd.f32 %v390_v4, %v386_v3 }
 0x1a4   :  { %486 = vtanh.f32 %v392_v5 }
 0x1aa   :  { %v487_v6 = vpop.eup %486 }
 0x1ab   :  { %v394_v7 = vmul.f32 2.0, %v487_v6 }
 0x1ad   :  { %395 = vst [vmem:[#allocation5] sm:$0x1] %v394_v7 }
 0x1ae   :  { %406 = dma.vmem_to_hbm [thread:$0]  %s402_s1, 16, %s404_s21, [#allocation4]  }
 0x1af   :  { %538 = dma.done.wait [#allocation4], 16  }
 0x1b0   :  { %539 = vsyncadd [#allocation4], 4294967280 }
 0x1b1   :  { %411 = vsyncpa [#allocation3], 1 }
 0x1b2   :  { %412 = vsyncpa [#allocation4], 1 }

</bundles_post_ra>
